<compile_context>
chip_gen: v7x
topology: tpu7x:2x2x1
jax: 0.10.0
libtpu: 0.0.40
codegen_flags: <defaults>
</compile_context>

<pallas_src>
import functools

import jax
import jax.numpy as jnp
from jax.experimental import pallas as pl
from jax.experimental.pallas import tpu as pltpu


def _round_up(x, m):
    return (x + m - 1) // m * m


def _vmem_limit_bytes():
    # Per-generation safe scoped-VMEM limit (v7x only has 64 MiB physical).
    try:
        cap = int(pltpu.get_tpu_info().vmem_capacity_bytes)
    except Exception:
        cap = 64 * 1024 * 1024
    return min(cap // 2, 48 * 1024 * 1024)


# --------------------------------------------------------------------------
# Kernels
# --------------------------------------------------------------------------

def _conv1x1_sigmoid_vpu_kernel(w_ref, b_ref, x_ref, o_ref, *, cin, cout):
    """Unrolled VPU contraction for tiny channel counts.

    w_ref: (cout, cin) f32 SMEM   b_ref: (cout,) f32 SMEM
    x_ref: (1, cin, rows, 128) f32 VMEM
    o_ref: (1, cout, rows, 128) f32 VMEM
    """
    for co in range(cout):
        acc = x_ref[0, 0] * w_ref[co, 0]
        for ci in range(1, cin):
            acc = acc + x_ref[0, ci] * w_ref[co, ci]
        z = acc + b_ref[co]
        # exp on the EUP; compute is filler under the HBM roofline.
        o_ref[0, co] = (1.0 / (1.0 + jnp.exp(-z))).astype(o_ref.dtype)


def _conv1x1_sigmoid_mxu_kernel(w_ref, b_ref, x_ref, o_ref):
    """MXU fallback for wide channel counts (flat lane-dense spatial axis).

    w_ref: (Cout, Cin) f32 VMEM   b_ref: (Cout, 1) f32 VMEM
    x_ref: (1, Cin, ts) f32 VMEM  o_ref: (1, Cout, ts) f32 VMEM
    """
    z = jnp.dot(w_ref[...], x_ref[0], preferred_element_type=jnp.float32)
    z = z + b_ref[...]
    o_ref[0] = (1.0 / (1.0 + jnp.exp(-z))).astype(o_ref.dtype)


# --------------------------------------------------------------------------
# Tiling helpers
# --------------------------------------------------------------------------

def _pick_rows(s_rows, cin, cout, vmem_limit):
    """Spatial-row tile for the (rows, 128) block layout."""
    bytes_per_row = (cin + cout) * 128 * 4          # f32 in + out per spatial row
    budget = vmem_limit // 2                         # headroom under scoped limit
    max_rows = max(budget // (2 * bytes_per_row), 8)  # 2x for double buffering
    if s_rows <= max_rows:
        return s_rows                                # full extent, no tail
    # Prefer a multiple of 8 that divides S exactly (no ragged tail blocks).
    t = (max_rows // 8) * 8
    cand = t
    while cand >= 8:
        if s_rows % cand == 0:
            return cand
        cand -= 8
    return t  # ragged tail handled by Pallas boundary masking


# --------------------------------------------------------------------------
# Wrapper: outconv forward (NCHW in / NCHW out, PyTorch weight layout)
# --------------------------------------------------------------------------

def outconv_forward(x_nchw, w, b):
    """x: (N, Cin, H, W) f32; w: (Cout, Cin, 1, 1); b: (Cout,). Returns NCHW f32."""
    N, Cin, H, W = x_nchw.shape
    Cout = w.shape[0]
    HW = H * W

    x = x_nchw.astype(jnp.float32)
    w2d = w.reshape(Cout, Cin).astype(jnp.float32)
    bvec = b.reshape(Cout).astype(jnp.float32)

    vmem_limit = _vmem_limit_bytes()

    # Keep NCHW; make the spatial axis lane-dense.  (N,Cin,H,W) -> (N,Cin,HW)
    # is a free reshape; padding only happens in the rare HW % 128 != 0 case.
    xf = x.reshape(N, Cin, HW)
    HWp = _round_up(HW, 128)
    if HWp != HW:
        # TODO(synk): ragged spatial size -> one pad pass; could be avoided
        # with a masked tail store instead.
        xf = jnp.pad(xf, ((0, 0), (0, 0), (0, HWp - HW)))

    if Cin * Cout <= 1024:
        # ---- VPU path: tiny channels, spatial on (sublanes, lanes) ----
        S = HWp // 128
        x4 = xf.reshape(N, Cin, S, 128)

        rows = _pick_rows(S, Cin, Cout, vmem_limit)
        # v7x has 2 TensorCores: make sure there are >= 2 parallel blocks.
        if N * pl.cdiv(S, rows) < 2 and S >= 16:
            rows = max(8, (S // 2) // 8 * 8)
        grid = (N, pl.cdiv(S, rows))

        kernel = functools.partial(_conv1x1_sigmoid_vpu_kernel, cin=Cin, cout=Cout)
        out4 = pl.pallas_call(
            kernel,
            out_shape=jax.ShapeDtypeStruct((N, Cout, S, 128), jnp.float32),
            grid_spec=pltpu.PrefetchScalarGridSpec(
                num_scalar_prefetch=0,
                grid=grid,
                in_specs=[
                    pl.BlockSpec(memory_space=pltpu.MemorySpace.SMEM),  # weight
                    pl.BlockSpec(memory_space=pltpu.MemorySpace.SMEM),  # bias
                    pl.BlockSpec((1, Cin, rows, 128), lambda n, s: (n, 0, s, 0)),
                ],
                out_specs=pl.BlockSpec((1, Cout, rows, 128),
                                       lambda n, s: (n, 0, s, 0)),
            ),
            compiler_params=pltpu.CompilerParams(
                dimension_semantics=("parallel", "parallel"),
                vmem_limit_bytes=vmem_limit),
        )(w2d, bvec, x4)
        outf = out4.reshape(N, Cout, HWp)
    else:
        # ---- MXU fallback: wide channels, flat lane-dense spatial axis ----
        bytes_per_col = (Cin + Cout) * 4
        max_cols = max(((vmem_limit // 2) // (2 * bytes_per_col)) // 128 * 128, 128)
        ts = min(HWp, max_cols)
        t = ts
        while t >= 128 and HWp % t != 0:
            t -= 128
        ts = t if t >= 128 else ts
        grid = (N, pl.cdiv(HWp, ts))

        outf = pl.pallas_call(
            _conv1x1_sigmoid_mxu_kernel,
            out_shape=jax.ShapeDtypeStruct((N, Cout, HWp), jnp.float32),
            grid_spec=pltpu.PrefetchScalarGridSpec(
                num_scalar_prefetch=0,
                grid=grid,
                in_specs=[
                    pl.BlockSpec((Cout, Cin), lambda n, s: (0, 0)),
                    pl.BlockSpec((Cout, 1), lambda n, s: (0, 0)),
                    pl.BlockSpec((1, Cin, ts), lambda n, s: (n, 0, s)),
                ],
                out_specs=pl.BlockSpec((1, Cout, ts), lambda n, s: (n, 0, s)),
            ),
            compiler_params=pltpu.CompilerParams(
                dimension_semantics=("parallel", "parallel"),
                vmem_limit_bytes=vmem_limit),
        )(w2d, bvec.reshape(Cout, 1), xf)

    if HWp != HW:
        outf = outf[:, :, :HW]
    return outf.reshape(N, Cout, H, W)


# --------------------------------------------------------------------------
# Main
# --------------------------------------------------------------------------

if __name__ == "__main__":
    key = jax.random.PRNGKey(0)
    kx, kw, kb = jax.random.split(key, 3)

    batch, in_ch, out_ch, hw = 2, 4, 3, 16
    x = jax.random.normal(kx, (batch, in_ch, hw, hw), jnp.float32)       # NCHW
    w = jax.random.normal(kw, (out_ch, in_ch, 1, 1), jnp.float32) * 0.5  # PyTorch layout
    b = jax.random.normal(kb, (out_ch,), jnp.float32) * 0.1

    fwd = jax.jit(outconv_forward)
    y = jax.block_until_ready(fwd(x, w, b))

    # Plain-JAX reference (f32) for correctness.
    ref = jax.nn.sigmoid(
        jnp.einsum('nchw,oc->nohw', x, w[:, :, 0, 0]) + b[None, :, None, None])

    assert y.shape == (batch, out_ch, hw, hw), y.shape
    assert bool(jnp.all(jnp.isfinite(y)))
    max_err = float(jnp.max(jnp.abs(y - ref)))
    assert max_err < 1e-4, f"max abs error {max_err}"  # f32-exact path

    print("KERNEL_OK")
</pallas_src>

<mosaic_0001>
module attributes {stable_mosaic.version = 11 : i64} {
  func.func @_conv1x1_sigmoid_vpu_kernel(%arg0: i32, %arg1: i32, %arg2: memref<3x4xf32, #tpu.memory_space<smem>>, %arg3: memref<3xf32, #tpu.memory_space<smem>>, %arg4: memref<1x4x2x128xf32, #tpu.memory_space<vmem>>, %arg5: memref<1x3x2x128xf32, #tpu.memory_space<vmem>>) attributes {dimension_semantics = [#tpu.dimension_semantics<parallel>, #tpu.dimension_semantics<parallel>], iteration_bounds = array<i64: 2, 1>, scalar_prefetch = 0 : i64, scratch_operands = 0 : i64, tpu.core_type = #tpu.core_type<tc>, window_params = [{transform_indices = @transform_0, window_bounds = array<i64: 3, 4>}, {transform_indices = @transform_1, window_bounds = array<i64: 3>}, {transform_indices = @transform_2, window_bounds = array<i64: 1, 4, 2, 128>}, {transform_indices = @transform_3, window_bounds = array<i64: 1, 3, 2, 128>}]} {
    %c0 = arith.constant 0 : index
    %c0_0 = arith.constant 0 : index
    %c0_1 = arith.constant 0 : index
    %c0_2 = arith.constant 0 : index
    %0 = vector.load %arg4[%c0, %c0_0, %c0_1, %c0_2] : memref<1x4x2x128xf32, #tpu.memory_space<vmem>>, vector<1x1x2x128xf32>
    %1 = vector.shape_cast %0 : vector<1x1x2x128xf32> to vector<2x128xf32>
    %c0_3 = arith.constant 0 : index
    %c0_4 = arith.constant 0 : index
    %2 = memref.load %arg2[%c0_3, %c0_4] : memref<3x4xf32, #tpu.memory_space<smem>>
    %3 = vector.broadcast %2 : f32 to vector<2x128xf32>
    %4 = arith.mulf %1, %3 : vector<2x128xf32>
    %c0_5 = arith.constant 0 : index
    %c1 = arith.constant 1 : index
    %c0_6 = arith.constant 0 : index
    %c0_7 = arith.constant 0 : index
    %5 = vector.load %arg4[%c0_5, %c1, %c0_6, %c0_7] : memref<1x4x2x128xf32, #tpu.memory_space<vmem>>, vector<1x1x2x128xf32>
    %6 = vector.shape_cast %5 : vector<1x1x2x128xf32> to vector<2x128xf32>
    %c0_8 = arith.constant 0 : index
    %c1_9 = arith.constant 1 : index
    %7 = memref.load %arg2[%c0_8, %c1_9] : memref<3x4xf32, #tpu.memory_space<smem>>
    %8 = vector.broadcast %7 : f32 to vector<2x128xf32>
    %9 = arith.mulf %6, %8 : vector<2x128xf32>
    %10 = arith.addf %4, %9 : vector<2x128xf32>
    %c0_10 = arith.constant 0 : index
    %c2 = arith.constant 2 : index
    %c0_11 = arith.constant 0 : index
    %c0_12 = arith.constant 0 : index
    %11 = vector.load %arg4[%c0_10, %c2, %c0_11, %c0_12] : memref<1x4x2x128xf32, #tpu.memory_space<vmem>>, vector<1x1x2x128xf32>
    %12 = vector.shape_cast %11 : vector<1x1x2x128xf32> to vector<2x128xf32>
    %c0_13 = arith.constant 0 : index
    %c2_14 = arith.constant 2 : index
    %13 = memref.load %arg2[%c0_13, %c2_14] : memref<3x4xf32, #tpu.memory_space<smem>>
    %14 = vector.broadcast %13 : f32 to vector<2x128xf32>
    %15 = arith.mulf %12, %14 : vector<2x128xf32>
    %16 = arith.addf %10, %15 : vector<2x128xf32>
    %c0_15 = arith.constant 0 : index
    %c3 = arith.constant 3 : index
    %c0_16 = arith.constant 0 : index
    %c0_17 = arith.constant 0 : index
    %17 = vector.load %arg4[%c0_15, %c3, %c0_16, %c0_17] : memref<1x4x2x128xf32, #tpu.memory_space<vmem>>, vector<1x1x2x128xf32>
    %18 = vector.shape_cast %17 : vector<1x1x2x128xf32> to vector<2x128xf32>
    %c0_18 = arith.constant 0 : index
    %c3_19 = arith.constant 3 : index
    %19 = memref.load %arg2[%c0_18, %c3_19] : memref<3x4xf32, #tpu.memory_space<smem>>
    %20 = vector.broadcast %19 : f32 to vector<2x128xf32>
    %21 = arith.mulf %18, %20 : vector<2x128xf32>
    %22 = arith.addf %16, %21 : vector<2x128xf32>
    %c0_20 = arith.constant 0 : index
    %23 = memref.load %arg3[%c0_20] : memref<3xf32, #tpu.memory_space<smem>>
    %24 = vector.broadcast %23 : f32 to vector<2x128xf32>
    %25 = arith.addf %22, %24 : vector<2x128xf32>
    %cst = arith.constant 0.000000e+00 : f32
    %26 = vector.broadcast %cst : f32 to vector<2x128xf32>
    %27 = arith.subf %26, %25 : vector<2x128xf32>
    %28 = math.exp %27 : vector<2x128xf32>
    %cst_21 = arith.constant 1.000000e+00 : f32
    %29 = vector.broadcast %cst_21 : f32 to vector<2x128xf32>
    %30 = arith.addf %29, %28 : vector<2x128xf32>
    %cst_22 = arith.constant 1.000000e+00 : f32
    %31 = vector.broadcast %cst_22 : f32 to vector<2x128xf32>
    %32 = arith.divf %31, %30 : vector<2x128xf32>
    %c0_23 = arith.constant 0 : index
    %c0_24 = arith.constant 0 : index
    %c0_25 = arith.constant 0 : index
    %c0_26 = arith.constant 0 : index
    %33 = vector.load %arg5[%c0_23, %c0_24, %c0_25, %c0_26] : memref<1x3x2x128xf32, #tpu.memory_space<vmem>>, vector<1x1x2x128xf32>
    %34 = vector.shape_cast %33 : vector<1x1x2x128xf32> to vector<2x128xf32>
    %35 = vector.shape_cast %32 : vector<2x128xf32> to vector<1x1x2x128xf32>
    tpu.vector_store %arg5[%c0_23, %c0_24, %c0_25, %c0_26], %35 {strides = array<i32>} : memref<1x3x2x128xf32, #tpu.memory_space<vmem>>, vector<1x1x2x128xf32>,
    %c0_27 = arith.constant 0 : index
    %c0_28 = arith.constant 0 : index
    %c0_29 = arith.constant 0 : index
    %c0_30 = arith.constant 0 : index
    %36 = vector.load %arg4[%c0_27, %c0_28, %c0_29, %c0_30] : memref<1x4x2x128xf32, #tpu.memory_space<vmem>>, vector<1x1x2x128xf32>
    %37 = vector.shape_cast %36 : vector<1x1x2x128xf32> to vector<2x128xf32>
    %c1_31 = arith.constant 1 : index
    %c0_32 = arith.constant 0 : index
    %38 = memref.load %arg2[%c1_31, %c0_32] : memref<3x4xf32, #tpu.memory_space<smem>>
    %39 = vector.broadcast %38 : f32 to vector<2x128xf32>
    %40 = arith.mulf %37, %39 : vector<2x128xf32>
    %c0_33 = arith.constant 0 : index
    %c1_34 = arith.constant 1 : index
    %c0_35 = arith.constant 0 : index
    %c0_36 = arith.constant 0 : index
    %41 = vector.load %arg4[%c0_33, %c1_34, %c0_35, %c0_36] : memref<1x4x2x128xf32, #tpu.memory_space<vmem>>, vector<1x1x2x128xf32>
    %42 = vector.shape_cast %41 : vector<1x1x2x128xf32> to vector<2x128xf32>
    %c1_37 = arith.constant 1 : index
    %c1_38 = arith.constant 1 : index
    %43 = memref.load %arg2[%c1_37, %c1_38] : memref<3x4xf32, #tpu.memory_space<smem>>
    %44 = vector.broadcast %43 : f32 to vector<2x128xf32>
    %45 = arith.mulf %42, %44 : vector<2x128xf32>
    %46 = arith.addf %40, %45 : vector<2x128xf32>
    %c0_39 = arith.constant 0 : index
    %c2_40 = arith.constant 2 : index
    %c0_41 = arith.constant 0 : index
    %c0_42 = arith.constant 0 : index
    %47 = vector.load %arg4[%c0_39, %c2_40, %c0_41, %c0_42] : memref<1x4x2x128xf32, #tpu.memory_space<vmem>>, vector<1x1x2x128xf32>
    %48 = vector.shape_cast %47 : vector<1x1x2x128xf32> to vector<2x128xf32>
    %c1_43 = arith.constant 1 : index
    %c2_44 = arith.constant 2 : index
    %49 = memref.load %arg2[%c1_43, %c2_44] : memref<3x4xf32, #tpu.memory_space<smem>>
    %50 = vector.broadcast %49 : f32 to vector<2x128xf32>
    %51 = arith.mulf %48, %50 : vector<2x128xf32>
    %52 = arith.addf %46, %51 : vector<2x128xf32>
    %c0_45 = arith.constant 0 : index
    %c3_46 = arith.constant 3 : index
    %c0_47 = arith.constant 0 : index
    %c0_48 = arith.constant 0 : index
    %53 = vector.load %arg4[%c0_45, %c3_46, %c0_47, %c0_48] : memref<1x4x2x128xf32, #tpu.memory_space<vmem>>, vector<1x1x2x128xf32>
    %54 = vector.shape_cast %53 : vector<1x1x2x128xf32> to vector<2x128xf32>
    %c1_49 = arith.constant 1 : index
    %c3_50 = arith.constant 3 : index
    %55 = memref.load %arg2[%c1_49, %c3_50] : memref<3x4xf32, #tpu.memory_space<smem>>
    %56 = vector.broadcast %55 : f32 to vector<2x128xf32>
    %57 = arith.mulf %54, %56 : vector<2x128xf32>
    %58 = arith.addf %52, %57 : vector<2x128xf32>
    %c1_51 = arith.constant 1 : index
    %59 = memref.load %arg3[%c1_51] : memref<3xf32, #tpu.memory_space<smem>>
    %60 = vector.broadcast %59 : f32 to vector<2x128xf32>
    %61 = arith.addf %58, %60 : vector<2x128xf32>
    %cst_52 = arith.constant 0.000000e+00 : f32
    %62 = vector.broadcast %cst_52 : f32 to vector<2x128xf32>
    %63 = arith.subf %62, %61 : vector<2x128xf32>
    %64 = math.exp %63 : vector<2x128xf32>
    %cst_53 = arith.constant 1.000000e+00 : f32
    %65 = vector.broadcast %cst_53 : f32 to vector<2x128xf32>
    %66 = arith.addf %65, %64 : vector<2x128xf32>
    %cst_54 = arith.constant 1.000000e+00 : f32
    %67 = vector.broadcast %cst_54 : f32 to vector<2x128xf32>
    %68 = arith.divf %67, %66 : vector<2x128xf32>
    %c0_55 = arith.constant 0 : index
    %c1_56 = arith.constant 1 : index
    %c0_57 = arith.constant 0 : index
    %c0_58 = arith.constant 0 : index
    %69 = vector.load %arg5[%c0_55, %c1_56, %c0_57, %c0_58] : memref<1x3x2x128xf32, #tpu.memory_space<vmem>>, vector<1x1x2x128xf32>
    %70 = vector.shape_cast %69 : vector<1x1x2x128xf32> to vector<2x128xf32>
    %71 = vector.shape_cast %68 : vector<2x128xf32> to vector<1x1x2x128xf32>
    tpu.vector_store %arg5[%c0_55, %c1_56, %c0_57, %c0_58], %71 {strides = array<i32>} : memref<1x3x2x128xf32, #tpu.memory_space<vmem>>, vector<1x1x2x128xf32>,
    %c0_59 = arith.constant 0 : index
    %c0_60 = arith.constant 0 : index
    %c0_61 = arith.constant 0 : index
    %c0_62 = arith.constant 0 : index
    %72 = vector.load %arg4[%c0_59, %c0_60, %c0_61, %c0_62] : memref<1x4x2x128xf32, #tpu.memory_space<vmem>>, vector<1x1x2x128xf32>
    %73 = vector.shape_cast %72 : vector<1x1x2x128xf32> to vector<2x128xf32>
    %c2_63 = arith.constant 2 : index
    %c0_64 = arith.constant 0 : index
    %74 = memref.load %arg2[%c2_63, %c0_64] : memref<3x4xf32, #tpu.memory_space<smem>>
    %75 = vector.broadcast %74 : f32 to vector<2x128xf32>
    %76 = arith.mulf %73, %75 : vector<2x128xf32>
    %c0_65 = arith.constant 0 : index
    %c1_66 = arith.constant 1 : index
    %c0_67 = arith.constant 0 : index
    %c0_68 = arith.constant 0 : index
    %77 = vector.load %arg4[%c0_65, %c1_66, %c0_67, %c0_68] : memref<1x4x2x128xf32, #tpu.memory_space<vmem>>, vector<1x1x2x128xf32>
    %78 = vector.shape_cast %77 : vector<1x1x2x128xf32> to vector<2x128xf32>
    %c2_69 = arith.constant 2 : index
    %c1_70 = arith.constant 1 : index
    %79 = memref.load %arg2[%c2_69, %c1_70] : memref<3x4xf32, #tpu.memory_space<smem>>
    %80 = vector.broadcast %79 : f32 to vector<2x128xf32>
    %81 = arith.mulf %78, %80 : vector<2x128xf32>
    %82 = arith.addf %76, %81 : vector<2x128xf32>
    %c0_71 = arith.constant 0 : index
    %c2_72 = arith.constant 2 : index
    %c0_73 = arith.constant 0 : index
    %c0_74 = arith.constant 0 : index
    %83 = vector.load %arg4[%c0_71, %c2_72, %c0_73, %c0_74] : memref<1x4x2x128xf32, #tpu.memory_space<vmem>>, vector<1x1x2x128xf32>
    %84 = vector.shape_cast %83 : vector<1x1x2x128xf32> to vector<2x128xf32>
    %c2_75 = arith.constant 2 : index
    %c2_76 = arith.constant 2 : index
    %85 = memref.load %arg2[%c2_75, %c2_76] : memref<3x4xf32, #tpu.memory_space<smem>>
    %86 = vector.broadcast %85 : f32 to vector<2x128xf32>
    %87 = arith.mulf %84, %86 : vector<2x128xf32>
    %88 = arith.addf %82, %87 : vector<2x128xf32>
    %c0_77 = arith.constant 0 : index
    %c3_78 = arith.constant 3 : index
    %c0_79 = arith.constant 0 : index
    %c0_80 = arith.constant 0 : index
    %89 = vector.load %arg4[%c0_77, %c3_78, %c0_79, %c0_80] : memref<1x4x2x128xf32, #tpu.memory_space<vmem>>, vector<1x1x2x128xf32>
    %90 = vector.shape_cast %89 : vector<1x1x2x128xf32> to vector<2x128xf32>
    %c2_81 = arith.constant 2 : index
    %c3_82 = arith.constant 3 : index
    %91 = memref.load %arg2[%c2_81, %c3_82] : memref<3x4xf32, #tpu.memory_space<smem>>
    %92 = vector.broadcast %91 : f32 to vector<2x128xf32>
    %93 = arith.mulf %90, %92 : vector<2x128xf32>
    %94 = arith.addf %88, %93 : vector<2x128xf32>
    %c2_83 = arith.constant 2 : index
    %95 = memref.load %arg3[%c2_83] : memref<3xf32, #tpu.memory_space<smem>>
    %96 = vector.broadcast %95 : f32 to vector<2x128xf32>
    %97 = arith.addf %94, %96 : vector<2x128xf32>
    %cst_84 = arith.constant 0.000000e+00 : f32
    %98 = vector.broadcast %cst_84 : f32 to vector<2x128xf32>
    %99 = arith.subf %98, %97 : vector<2x128xf32>
    %100 = math.exp %99 : vector<2x128xf32>
    %cst_85 = arith.constant 1.000000e+00 : f32
    %101 = vector.broadcast %cst_85 : f32 to vector<2x128xf32>
    %102 = arith.addf %101, %100 : vector<2x128xf32>
    %cst_86 = arith.constant 1.000000e+00 : f32
    %103 = vector.broadcast %cst_86 : f32 to vector<2x128xf32>
    %104 = arith.divf %103, %102 : vector<2x128xf32>
    %c0_87 = arith.constant 0 : index
    %c2_88 = arith.constant 2 : index
    %c0_89 = arith.constant 0 : index
    %c0_90 = arith.constant 0 : index
    %105 = vector.load %arg5[%c0_87, %c2_88, %c0_89, %c0_90] : memref<1x3x2x128xf32, #tpu.memory_space<vmem>>, vector<1x1x2x128xf32>
    %106 = vector.shape_cast %105 : vector<1x1x2x128xf32> to vector<2x128xf32>
    %107 = vector.shape_cast %104 : vector<2x128xf32> to vector<1x1x2x128xf32>
    tpu.vector_store %arg5[%c0_87, %c2_88, %c0_89, %c0_90], %107 {strides = array<i32>} : memref<1x3x2x128xf32, #tpu.memory_space<vmem>>, vector<1x1x2x128xf32>,
    return
  }
  func.func @transform_0(%arg0: i32, %arg1: i32) -> (i32, i32) {
    %c0_i32 = arith.constant 0 : i32
    %c0_i32_0 = arith.constant 0 : i32
    %c0_i32_1 = arith.constant 0 : i32
    return %c0_i32, %c0_i32_0 : i32, i32
  }
  func.func @transform_1(%arg0: i32, %arg1: i32) -> i32 {
    %c0_i32 = arith.constant 0 : i32
    %c0_i32_0 = arith.constant 0 : i32
    return %c0_i32 : i32
  }
  func.func @transform_2(%arg0: i32, %arg1: i32) -> (i32, i32, i32, i32) {
    %c0_i32 = arith.constant 0 : i32
    %c0_i32_0 = arith.constant 0 : i32
    %c0_i32_1 = arith.constant 0 : i32
    return %arg0, %c0_i32, %arg1, %c0_i32_0 : i32, i32, i32, i32
  }
  func.func @transform_3(%arg0: i32, %arg1: i32) -> (i32, i32, i32, i32) {
    %c0_i32 = arith.constant 0 : i32
    %c0_i32_0 = arith.constant 0 : i32
    %c0_i32_1 = arith.constant 0 : i32
    return %arg0, %c0_i32, %arg1, %c0_i32_0 : i32, i32, i32, i32
  }
}

</mosaic_0001>

<bundles_post_ra>
// kernel: outconv_forward.1
= control target key start
LH: loop header
LB: loop body
LE: loop exit
PB: predicated region body
PF: predicated region fallthrough
CT: control target
= control target key end

     0   :  { %8 = vsyncpa [#allocation3], 0  ;;  %s708_s0 = inlined_call_operand.vmem [shape: f32[3,4], index: 0, kind: input, shape index: {}]   ;;  %s709_s1 = inlined_call_operand.vmem [shape: f32[3], index: 1, kind: input, shape index: {}]   ;;  %s710_s2 = inlined_call_operand.vmem [shape: f32[2,4,2,128], index: 2, kind: input, shape index: {}]   ;;  %s711_s3 = inlined_call_operand.vmem [shape: f32[2,3,2,128], index: 3, kind: output, shape index: {}]  }
   0x1   :  { %9 = vsyncpa [#allocation5], 0  ;;  %s608_s12 = smov 0   ;;  %s610_s13 = smov 0  }
   0x2   :  { %s612_s14 = smov 0  }
   0x3 LB: > { %s427_s15 = sadd.s32 4294967295, %s584_s14   ;;  %s27_s16 = sadd.s32 1, %s580_s13  ;;  %s584_s14 = sphi %s612_s14, %s15_s14   ;;  %s580_s13 = sphi %s610_s13, %s721_s13   ;;  %s576_s12 = sphi %s608_s12, %s720_s12  }
   0x4   : > { %p29_p0 = scmp.ge.s32.totalorder %s27_s16, 2  ;;  %p429_p1 = scmp.ge.s32.totalorder %s584_s14, 1 }
   0x5   : > { %p130_p2 = scmp.lt.s32.totalorder %s584_s14, 3  ;;  %p633_p4 = scmp.eq.s32.totalorder %s427_s15, 0 }
   0x6   : > { %s723_s16 = smov (%p29_p0, %s27_s16), 0  ;;  %s143_s21 = sshll.u32 %s708_s0, 4  ;;  %s144_s21 = int_to_ptr.vmem [resolvable:$true] %s143_s21 }
   0x7   : > { %p629_p3 = pnand %p429_p1, %p130_p2  ;;  %s154_s24 = sshll.u32 %s709_s1, 4  ;;  %s155_s24 = int_to_ptr.vmem [resolvable:$true] %s154_s24 }
   0x8   : > { %s716_s18 = scalar_select %p633_p4, 1, 0 }
   0x9   : > { %s715_s17 = scalar_select %p629_p3, 1, 0 }
   0xa   : > { %p475_p5 = pneg %p629_p3  ;;  %s524_s26 = scalar_lea.vmem %s144_s21, 64 }
   0xb   : > { %p525_p7 = scmp.ne.s32.totalorder %s144_s21, %s524_s26  ;;  %p532_p11 = scmp.lt.s32.totalorder %s144_s21, %s144_s21 }
   0xc   : > { %p647_p6 = pnand %p633_p4, %p475_p5  ;;  %p533_p12 = scmp.lt.s32.totalorder %s524_s26, %s524_s26 }
   0xe   : > { %p526_p8 = pneg %p647_p6  ;;  %p534_p13 = por %p533_p12, %p532_p11 }
  0x10   : > { %p527_p9 = pnand %p526_p8, %p525_p7 }
  0x12   : > { %p528_p10 = pneg %p527_p9 }
  0x14   : > { %p535_p0 = pnand %p534_p13, %p528_p10 }
  0x16   : > { %538 = shalt.err (!%p535_p0)
}
  0x17   : > { %s586_s27 = smov [#allocation2]   ;;  %s539_s28 = scalar_lea.vmem %s155_s24, 16 }
  0x18   : > { %478 = dma.vmem_to_smem (!%p647_p6), %s144_s21, 64, %s586_s27, [#allocation3]  }
  0x19   : > { %p540_p1 = scmp.ne.s32.totalorder %s155_s24, %s539_s28  ;;  %p547_p4 = scmp.lt.s32.totalorder %s155_s24, %s155_s24 }
  0x1a   : > { %p548_p3 = scmp.lt.s32.totalorder %s539_s28, %s539_s28 }
  0x1b   : > { %p542_p2 = pnand %p540_p1, %p526_p8 }
  0x1c   : > { %p549_p7 = por %p548_p3, %p547_p4 }
  0x1d   : > { %p543_p5 = pneg %p542_p2 }
  0x1f   : > { %p550_p9 = pnand %p549_p7, %p543_p5 }
  0x21   : > { %553 = shalt.err (!%p550_p9)
}
  0x22   : > { %s587_s29 = smov [#allocation4]   ;;  %p718_p10 = scmp.ne.s32.totalorder %s715_s17, 0 }
  0x23   : > { %481 = dma.vmem_to_smem (!%p647_p6), %s155_s24, 16, %s587_s29, [#allocation5]  }
  0x24   : > { %178 = sbr.rel (%p718_p10) target bundleno = 102 (0x66), region = 32  ;;  %p719_p11 = scmp.ne.s32.totalorder (!%p718_p10), %s716_s18, 0 }
  0x2b   : > { %567 = dma.done.wait (%p719_p11), [#allocation3], 64  }
  0x2c   : > { %569 = vsyncadd (%p719_p11), [#allocation3], 4294967232 }
  0x2d   : > { %571 = dma.done.wait (%p719_p11), [#allocation5], 16  }
  0x2e   : > { %573 = vsyncadd (%p719_p11), [#allocation5], 4294967280 }
  0x2f   : > { %188 = sfence }
  0x30   : > { %p213_p3 = scmp.lt.s32.totalorder %s576_s12, 1  ;;  %s230_s30 = sld [smem:[#allocation2]] }
  0x31   : > { %s440_s4 = sld [smem:[#allocation2 + $0x1]]  ;;  %s442_s5 = sld [smem:[#allocation2 + $0x2]] }
  0x32   : > { %s725_s12 = smov (!%p213_p3, %s576_s12), 1  ;;  %s444_s6 = sld [smem:[#allocation2 + $0x3]] }
  0x33   : > { %s465_s7 = sshll.u32 %s725_s12, 3  ;;  %s672_s8 = sld [smem:[#allocation4]] }
  0x34   : > { %s677_s11 = scalar_lea.vmem %s710_s2, %s465_s7  ;;  %s445_s15 = sld [smem:[#allocation2 + $0x80]] }
  0x35   : > { %v229_v0 = vld [vmem:[%s677_s11] sm:$0x3]  ;;  %v439_v2 = vld [vmem:[%s677_s11 + $0x2] sm:$0x3]  ;;  %v441_v3 = vld [vmem:[%s677_s11 + $0x4] sm:$0x3] }
  0x36   : > { %v231_v1 = vstv %s230_s30  ;;  %v443_v7 = vld [vmem:[%s677_s11 + $0x6] sm:$0x3]  ;;  %s447_s17 = sld [smem:[#allocation2 + $0x81]]  ;;  %s449_s18 = sld [smem:[#allocation2 + $0x82]]  ;;  %v261_v11 = vld [vmem:[%s677_s11] sm:$0x3] }
  0x37   : > { %v232_v4 = vmul.f32 %v231_v1, %v229_v0  ;;  %v236_v5 = vstv %s440_s4  ;;  %v242_v6 = vstv %s442_s5  ;;  %s451_s19 = sld [smem:[#allocation2 + $0x83]]  ;;  %s684_s20 = sld [smem:[#allocation4 + $0x1]]  ;;  %v446_v15 = vld [vmem:[%s677_s11 + $0x2] sm:$0x3]  ;;  %v448_v18 = vld [vmem:[%s677_s11 + $0x4] sm:$0x3] }
  0x38   : > { %v237_v8 = vmul.f32 %v439_v2, %v236_v5  ;;  %v243_v9 = vmul.f32 %v441_v3, %v242_v6  ;;  %v248_v10 = vstv %s444_s6  ;;  %s454_s21 = sld [smem:[#allocation2 + $0x100]]  ;;  %s456_s22 = sld [smem:[#allocation2 + $0x101]]  ;;  %v450_v21 = vld [vmem:[%s677_s11 + $0x6] sm:$0x3]  ;;  %v291_v25 = vld [vmem:[%s677_s11] sm:$0x3] }
  0x39   : > { %v249_v13 = vmul.f32 %v443_v7, %v248_v10  ;;  %s458_s23 = sld [smem:[#allocation2 + $0x102]]  ;;  %s460_s24 = sld [smem:[#allocation2 + $0x103]]  ;;  %v252_v19 = vstv %s672_s8  ;;  %v455_v28 = vld [vmem:[%s677_s11 + $0x2] sm:$0x3]  ;;  %v457_v29 = vld [vmem:[%s677_s11 + $0x4] sm:$0x3] }
  0x3a   : > { %v238_v12 = vadd.f32 %v237_v8, %v232_v4  ;;  %v263_v14 = vstv %s445_s15  ;;  %s461_s25 = sld [smem:[#allocation4 + $0x2]]  ;;  %v459_v37 = vld [vmem:[%s677_s11 + $0x6] sm:$0x3]  ;;  %s466_s26 = smul.u32 6, %s725_s12 }
  0x3b   : > { %v264_v17 = vmul.f32 %v263_v14, %v261_v11 }
  0x3c   : > { %v244_v16 = vadd.f32 %v243_v9, %v238_v12  ;;  %v267_v20 = vstv %s447_s17  ;;  %v272_v24 = vstv %s449_s18  ;;  %s228_s29 = scalar_lea.vmem %s711_s3, %s466_s26 }
  0x3d   : > { %v268_v23 = vmul.f32 %v446_v15, %v267_v20  ;;  %v273_v26 = vmul.f32 %v448_v18, %v272_v24  ;;  %v277_v27 = vstv %s451_s19  ;;  %v281_v42 = vstv %s684_s20 }
  0x3e   : > { %v250_v22 = vadd.f32 %v249_v13, %v244_v16  ;;  %v278_v32 = vmul.f32 %v450_v21, %v277_v27  ;;  %v293_v33 = vstv %s454_s21  ;;  %v297_v35 = vstv %s456_s22 }
  0x3f   : > { %v269_v31 = vadd.f32 %v268_v23, %v264_v17  ;;  %v294_v34 = vmul.f32 %v293_v33, %v291_v25  ;;  %v302_v36 = vstv %s458_s23  ;;  %v298_v40 = vmul.f32 %v455_v28, %v297_v35 }
  0x40   : > { %v253_v30 = vadd.f32 %v252_v19, %v250_v22  ;;  %v303_v41 = vmul.f32 %v457_v29, %v302_v36  ;;  %v307_v43 = vstv %s460_s24  ;;  %v311_v50 = vstv %s461_s25 }
  0x41   : > { %v274_v39 = vadd.f32 %v273_v26, %v269_v31  ;;  %v299_v46 = vadd.f32 %v298_v40, %v294_v34  ;;  %v308_v47 = vmul.f32 %v459_v37, %v307_v43 }
  0x42   : > { %v254_v38 = vsub.f32 0.0, %v253_v30 }
  0x43   : > { %v279_v45 = vadd.f32 %v278_v32, %v274_v39  ;;  %v304_v49 = vadd.f32 %v303_v41, %v299_v46 }
  0x44   : > { %v255_v44 = vmul.f32 1.442695, %v254_v38 }
  0x45   : > { %v282_v48 = vadd.f32 %v281_v42, %v279_v45  ;;  %v309_v52 = vadd.f32 %v308_v47, %v304_v49 }
  0x46   : > { %512 = vpow2.f32 %v255_v44 }
  0x47   : > { %v283_v51 = vsub.f32 0.0, %v282_v48  ;;  %v312_v54 = vadd.f32 %v311_v50, %v309_v52 }
  0x49   : > { %v284_v53 = vmul.f32 1.442695, %v283_v51  ;;  %v313_v55 = vsub.f32 0.0, %v312_v54 }
  0x4b   : > { %514 = vpow2.f32 %v284_v53  ;;  %v314_v56 = vmul.f32 1.442695, %v313_v55 }
  0x4d   : > { %516 = vpow2.f32 %v314_v56 }
  0x50   : > { %v513_v57 = vpop.eup %512 }
  0x51   : > { %v257_v58 = vadd.f32 1.0, %v513_v57 }
  0x53   : > { %518 = vrcp.f32 %v257_v58 }
  0x55   : > { %v515_v59 = vpop.eup %514 }
  0x56   : > { %v286_v60 = vadd.f32 1.0, %v515_v59 }
  0x57   : > { %v517_v61 = vpop.eup %516 }
  0x58   : > { %520 = vrcp.f32 %v286_v60  ;;  %v316_v62 = vadd.f32 1.0, %v517_v61 }
  0x5a   : > { %522 = vrcp.f32 %v316_v62 }
  0x5d   : > { %v519_v63 = vpop.eup %518 }
  0x5e   : > { %260 = vst [vmem:[%s228_s29] sm:$0x3] %v519_v63 }
  0x62   : > { %v521_v0 = vpop.eup %520 }
  0x63   : > { %453 = vst [vmem:[%s228_s29 + $0x2] sm:$0x3] %v521_v0 }
  0x64   : > { %v523_v1 = vpop.eup %522 }
  0x65   : > { %462 = vst [vmem:[%s228_s29 + $0x4] sm:$0x3] %v523_v1 }
  0x66 PF: > { %s15_s14 = sadd.s32 1, %s584_s14   ;;  %s720_s12 = smov %s580_s13 }
  0x67   : > { %p12_p4 = scmp.ge.s32.totalorder %s15_s14, 4   ;;  %s721_s13 = smov %s723_s16 }
  0x69   :  { %14 = sbr.rel (!%p12_p4) target bundleno = 3 (0x3), region = 76 }
  0x70   :  { %348 = vsyncpa [#allocation3], 1 }
  0x71   :  { %350 = vsyncpa [#allocation3 + $0x1], 1 }
  0x72   :  { %351 = vsyncpa [#allocation5], 1 }

</bundles_post_ra>
